<compile_context>
chip_gen: v7x
topology: tpu7x:2x2x1
jax: 0.10.0
libtpu: 0.0.40
codegen_flags: <defaults>
</compile_context>

<pallas_src>
import functools

import jax
import jax.numpy as jnp
from jax.experimental import pallas as pl
from jax.experimental.pallas import tpu as pltpu

_SUB = 8            # f32 sublane granularity
_LANE = 128         # lane granularity
_L_CAP = 4096       # max spatial-tile width (multiple of 128)
# ~6 MiB of f32 compute per input tile: double-buffered input stream plus a
# couple of live full-tile temporaries stays inside a 32 MiB scoped-VMEM budget
# on every generation (v5e raised explicitly below; v6e/v7x default).
_TARGET_TILE_ELEMS = (6 * 1024 * 1024) // 4


def _round_up(a, b):
    return -(-a // b) * b


def _int_pow(x, n):
    """x**n for a static positive int n via repeated VPU multiplies."""
    assert n >= 1
    result, base = None, x
    while n:
        if n & 1:
            result = base if result is None else result * base
        n >>= 1
        if n:
            base = base * base
    return result


def _pow_p(xc, p_ref, p_int):
    if p_int is not None:
        return _int_pow(xc, p_int)               # VPU-only fast path
    return jnp.exp(p_ref[0] * jnp.log(xc))       # general learned-p path (EUP)


def _root_p(mean, p_ref, p_int):
    inv_p = (1.0 / p_int) if p_int is not None else (1.0 / p_ref[0])
    return jnp.exp(jnp.log(mean) * inv_p)        # once per row tile: negligible


def _gem_kernel_single(p_ref, x_ref, o_ref, *, eps, inv_l, p_int):
    """grid_j == 1 (L fits one tile): no scratch accumulator, direct write."""
    xc = jnp.maximum(x_ref[...].astype(jnp.float32), eps)   # clamp (VPU)
    powed = _pow_p(xc, p_ref, p_int)
    mean = jnp.sum(powed, axis=1, keepdims=True) * inv_l     # one XLU reduce
    o_ref[...] = _root_p(mean, p_ref, p_int).astype(o_ref.dtype)


def _gem_kernel_acc(p_ref, x_ref, o_ref, acc_ref, *, eps, true_l, tl,
                    needs_mask, p_int):
    """grid_j > 1: lane-dense (tm, 128) accumulator across the spatial axis."""
    j = pl.program_id(1)

    @pl.when(j == 0)
    def _():
        acc_ref[...] = jnp.zeros_like(acc_ref)

    xc = jnp.maximum(x_ref[...].astype(jnp.float32), eps)
    powed = _pow_p(xc, p_ref, p_int)

    if needs_mask:
        # Only the ragged final j-block has out-of-range lanes; the (1, tl)
        # iota + compare + select is cheap whole-vreg VPU filler.
        col = jax.lax.broadcasted_iota(jnp.int32, (1, tl), 1)
        powed = jnp.where(col < (true_l - j * tl), powed, 0.0)

    # Whole-vreg VPU adds only; the cross-lane XLU reduce and the narrow
    # (tm, 1) store are deferred to the finalize step.
    partial = powed[:, 0:_LANE]
    for k in range(1, tl // _LANE):
        partial = partial + powed[:, k * _LANE:(k + 1) * _LANE]
    acc_ref[...] += partial

    @pl.when(j == pl.num_programs(1) - 1)
    def _():
        mean = jnp.sum(acc_ref[...], axis=1, keepdims=True) * (1.0 / true_l)
        o_ref[...] = _root_p(mean, p_ref, p_int).astype(o_ref.dtype)


def gem_forward(x, p, eps=1e-6, p_int=None):
    """GeM forward.  x: (N, C, H, W), p: (1,)  ->  (N, C, 1, 1) in x.dtype.

    p_int: optional *static* positive int.  When the learned p is known to be
    an integer (e.g. the default p=3), x**p is computed with VPU multiplies
    instead of EUP exp/log.
    """
    N, C, H, W = x.shape
    M, L = N * C, H * W
    x2 = x.reshape(M, L)                        # adjacent-dim merge: free, no copy
    p_smem = p.reshape(1).astype(jnp.float32)   # learned scalar exponent -> SMEM

    # ---- spatial (reduction) axis tiling ------------------------------------
    if L <= _L_CAP:
        tl, grid_j = L, 1                       # full extent: no mask, no padding
    else:
        tl = _L_CAP                             # multiple of 128
        grid_j = pl.cdiv(L, tl)                 # ragged final block is masked

    # ---- row axis tiling -----------------------------------------------------
    tm = min(2048, max(_SUB, (_TARGET_TILE_ELEMS // max(tl, 1)) // _SUB * _SUB))
    if tm >= M:
        tm = M                                  # full-extent block
        if M > _SUB:                            # give megacore >= 2 row tiles
            half = _round_up(pl.cdiv(M, 2), _SUB)
            if half < M:
                tm = half
    grid_i = pl.cdiv(M, tm)

    n_elem = M * L
    cost = pl.CostEstimate(
        flops=6 * n_elem,
        transcendentals=(0 if p_int is not None else 2 * n_elem) + 2 * M,
        bytes_accessed=n_elem * x2.dtype.itemsize + M * x.dtype.itemsize + 4,
    )
    cparams = dict(vmem_limit_bytes=32 * 1024 * 1024)

    if grid_j == 1:
        kernel = functools.partial(
            _gem_kernel_single, eps=float(eps), inv_l=1.0 / L, p_int=p_int)
        out = pl.pallas_call(
            kernel,
            grid=(grid_i,),
            in_specs=[
                pl.BlockSpec(memory_space=pltpu.MemorySpace.SMEM),   # p scalar
                pl.BlockSpec((tm, tl), lambda i: (i, 0)),            # x row tile
            ],
            out_specs=pl.BlockSpec((tm, 1), lambda i: (i, 0)),
            out_shape=jax.ShapeDtypeStruct((M, 1), x.dtype),
            compiler_params=pltpu.CompilerParams(
                dimension_semantics=("parallel",), **cparams),
            cost_estimate=cost,
        )(p_smem, x2)
    else:
        kernel = functools.partial(
            _gem_kernel_acc, eps=float(eps), true_l=L, tl=tl,
            needs_mask=(L % tl != 0), p_int=p_int)
        out = pl.pallas_call(
            kernel,
            grid=(grid_i, grid_j),
            in_specs=[
                pl.BlockSpec(memory_space=pltpu.MemorySpace.SMEM),   # p scalar
                pl.BlockSpec((tm, tl), lambda i, j: (i, j)),         # x tile stream
            ],
            out_specs=pl.BlockSpec((tm, 1), lambda i, j: (i, 0)),
            out_shape=jax.ShapeDtypeStruct((M, 1), x.dtype),
            scratch_shapes=[pltpu.VMEM((tm, _LANE), jnp.float32)],   # lane-dense acc
            compiler_params=pltpu.CompilerParams(
                dimension_semantics=("parallel", "arbitrary"), **cparams),
            cost_estimate=cost,
        )(p_smem, x2)

    return out.reshape(N, C, 1, 1)


def _ref_gem(x, p, eps=1e-6):
    """Plain-JAX reference mirroring the PyTorch gem()."""
    xp = jnp.maximum(x.astype(jnp.float32), eps) ** p[0]
    return jnp.mean(xp, axis=(2, 3), keepdims=True) ** (1.0 / p[0])


if __name__ == "__main__":
    key = jax.random.PRNGKey(0)
    k1, k2 = jax.random.split(key)

    p = jnp.ones((1,), jnp.float32) * 3.0                      # GeM Parameter (p=3)

    # 1) Common case: small feature map, single spatial tile, learned-p path.
    x = jax.random.normal(k1, (2, 4, 16, 16), jnp.float32)
    fwd = jax.jit(functools.partial(gem_forward, eps=1e-6))
    out = jax.block_until_ready(fwd(x, p))
    assert out.shape == (2, 4, 1, 1) and out.dtype == jnp.float32
    ref = _ref_gem(x, p)
    assert bool(jnp.allclose(out, ref, rtol=1e-4, atol=1e-6)), \
        float(jnp.max(jnp.abs(out - ref)))

    # 2) Integer-p fast path (VPU multiplies instead of EUP exp/log).
    fwd_fast = jax.jit(functools.partial(gem_forward, eps=1e-6, p_int=3))
    out_fast = jax.block_until_ready(fwd_fast(x, p))
    assert bool(jnp.allclose(out_fast, ref, rtol=1e-4, atol=1e-6)), \
        float(jnp.max(jnp.abs(out_fast - ref)))

    # 3) Large spatial extent: multi-tile reduction with lane-dense accumulator
    #    and a masked ragged final L block (no padding, no extra HBM pass).
    xl = jax.random.normal(k2, (2, 4, 72, 72), jnp.float32)    # L = 5184 > 4096
    out_l = jax.block_until_ready(fwd(xl, p))
    ref_l = _ref_gem(xl, p)
    assert out_l.shape == (2, 4, 1, 1)
    assert bool(jnp.allclose(out_l, ref_l, rtol=1e-4, atol=1e-6)), \
        float(jnp.max(jnp.abs(out_l - ref_l)))

    print("KERNEL_OK")
</pallas_src>

<mosaic_0001>
module attributes {stable_mosaic.version = 11 : i64} {
  func.func @_gem_kernel_single(%arg0: i32, %arg1: memref<1xf32, #tpu.memory_space<smem>>, %arg2: memref<8x256xf32, #tpu.memory_space<vmem>>, %arg3: memref<8x1xf32, #tpu.memory_space<vmem>>) attributes {dimension_semantics = [#tpu.dimension_semantics<parallel>], iteration_bounds = array<i64: 1>, scalar_prefetch = 0 : i64, scratch_operands = 0 : i64, tpu.core_type = #tpu.core_type<tc>, window_params = [{transform_indices = @transform_0, window_bounds = array<i64: 1>}, {transform_indices = @transform_1, window_bounds = array<i64: 8, 256>}, {transform_indices = @transform_2, window_bounds = array<i64: 8, 1>}]} {
    %c0 = arith.constant 0 : index
    %c0_0 = arith.constant 0 : index
    %0 = vector.load %arg2[%c0, %c0_0] : memref<8x256xf32, #tpu.memory_space<vmem>>, vector<8x256xf32>
    %cst = arith.constant 9.99999997E-7 : f32
    %1 = vector.broadcast %cst : f32 to vector<8x256xf32>
    %2 = arith.maximumf %0, %1 : vector<8x256xf32>
    %c0_1 = arith.constant 0 : index
    %3 = memref.load %arg1[%c0_1] : memref<1xf32, #tpu.memory_space<smem>>
    %4 = math.log %2 : vector<8x256xf32>
    %5 = vector.broadcast %3 : f32 to vector<8x256xf32>
    %6 = arith.mulf %5, %4 : vector<8x256xf32>
    %7 = math.exp %6 : vector<8x256xf32>
    %cst_2 = arith.constant dense<0.000000e+00> : vector<8xf32>
    %8 = vector.multi_reduction <add>, %7, %cst_2 [1] : vector<8x256xf32> to vector<8xf32>
    %9 = vector.shape_cast %8 : vector<8xf32> to vector<8x1xf32>
    %cst_3 = arith.constant 3.906250e-03 : f32
    %10 = vector.broadcast %cst_3 : f32 to vector<8x1xf32>
    %11 = arith.mulf %9, %10 : vector<8x1xf32>
    %c0_4 = arith.constant 0 : index
    %12 = memref.load %arg1[%c0_4] : memref<1xf32, #tpu.memory_space<smem>>
    %cst_5 = arith.constant 1.000000e+00 : f32
    %13 = arith.divf %cst_5, %12 : f32
    %14 = math.log %11 : vector<8x1xf32>
    %15 = vector.broadcast %13 : f32 to vector<8x1xf32>
    %16 = arith.mulf %14, %15 : vector<8x1xf32>
    %17 = math.exp %16 : vector<8x1xf32>
    %c0_6 = arith.constant 0 : index
    %c0_7 = arith.constant 0 : index
    %18 = vector.load %arg3[%c0_6, %c0_7] : memref<8x1xf32, #tpu.memory_space<vmem>>, vector<8x1xf32>
    tpu.vector_store %arg3[%c0_6, %c0_7], %17 {strides = array<i32>} : memref<8x1xf32, #tpu.memory_space<vmem>>, vector<8x1xf32>,
    return
  }
  func.func @transform_0(%arg0: i32) -> i32 {
    %c0_i32 = arith.constant 0 : i32
    %c0_i32_0 = arith.constant 0 : i32
    return %c0_i32 : i32
  }
  func.func @transform_1(%arg0: i32) -> (i32, i32) {
    %c0_i32 = arith.constant 0 : i32
    %c0_i32_0 = arith.constant 0 : i32
    return %arg0, %c0_i32 : i32, i32
  }
  func.func @transform_2(%arg0: i32) -> (i32, i32) {
    %c0_i32 = arith.constant 0 : i32
    %c0_i32_0 = arith.constant 0 : i32
    return %arg0, %c0_i32 : i32, i32
  }
}

</mosaic_0001>

<bundles_post_ra>
// kernel: gem_forward.1
= control target key start
LH: loop header
LB: loop body
LE: loop exit
PB: predicated region body
PF: predicated region fallthrough
CT: control target
= control target key end

     0   :  { %vm41_vm0 = vcmask 7168   ;;  %s90_s0 = inlined_call_operand.<no memory space> [shape: f32[1], index: 0, kind: input, shape index: {}]   ;;  %s91_s1 = inlined_call_operand.vmem [shape: f32[8,256], index: 1, kind: input, shape index: {}]   ;;  %s92_s2 = inlined_call_operand.vmem [shape: f32[8,1], index: 2, kind: output, shape index: {}]  }
   0x1   :  { %v12_v0 = vld [vmem:[%s91_s1] sm:$0xff]  ;;  %v13_v1 = vld [vmem:[%s91_s1 + $0x8] sm:$0xff]  ;;  %v21_v2 = vstv %s90_s0 }
   0x2   :  { %v14_v3 = vmax.f32 %v12_v0, 1e-06  ;;  %v15_v4 = vmax.f32 %v13_v1, 1e-06  ;;  %49 = vrcp.f32 %v21_v2 }
   0x4   :  { %51 = vlog2.f32 %v14_v3 }
   0x5   :  { %53 = vlog2.f32 %v15_v4 }
   0xc   :  { %v50_v5 = vpop.eup %49 }
   0xd   :  { %47 = vpush %v50_v5 }
   0xe   :  { %v52_v6 = vpop.eup %51 }
   0xf   :  { %v54_v7 = vpop.eup %53  ;;  %v18_v8 = vmul.f32 0.6931472, %v52_v6 }
  0x10   :  { %v20_v9 = vmul.f32 0.6931472, %v54_v7 }
  0x11   :  { %v22_v10 = vmul.f32 %v21_v2, %v18_v8 }
  0x12   :  { %v23_v11 = vmul.f32 %v21_v2, %v20_v9 }
  0x13   :  { %v24_v12 = vmul.f32 1.442695, %v22_v10 }
  0x14   :  { %v26_v13 = vmul.f32 1.442695, %v23_v11 }
  0x15   :  { %55 = vpow2.f32 %v24_v12 }
  0x16   :  { %57 = vpow2.f32 %v26_v13 }
  0x1f   :  { %v56_v14 = vpop.eup %55 }
  0x20   :  { %v58_v15 = vpop.eup %57 }
  0x21   :  { %v28_v16 = vadd.f32 %v58_v15, %v56_v14 }
  0x23   :  { %29 = vadd.xlane.f32.xlu0 %v28_v16 }
  0x3e   :  { %s48_s0 = spop %47 }
  0x3f   :  { %v37_v20 = vstv %s48_s0 }
  0xb0   :  { %v30_v17 = vpop.xlane.xlu0 %29 }
  0xb1   :  { %v31_v18 = vmul.f32 0.00390625, %v30_v17 }
  0xb3   :  { %59 = vlog2.f32 %v31_v18 }
  0xbd   :  { %v60_v19 = vpop.eup %59 }
  0xbe   :  { %v36_v21 = vmul.f32 0.6931472, %v60_v19 }
  0xc0   :  { %v38_v22 = vmul.f32 %v37_v20, %v36_v21 }
  0xc2   :  { %v39_v23 = vmul.f32 1.442695, %v38_v22 }
  0xc4   :  { %61 = vpow2.f32 %v39_v23 }
  0xce   :  { %v62_v24 = vpop.eup %61 }
  0xcf   :  { %42 = vst.msk [vmem:[%s92_s2] sm:$0xff] %vm41_vm0, %v62_v24 }

</bundles_post_ra>
